<compile_context>
chip_gen: v7x
topology: tpu7x:2x2x1
jax: 0.10.0
libtpu: 0.0.40
codegen_flags: <defaults>
</compile_context>

<pallas_src>
import jax
import jax.numpy as jnp
from jax.experimental import pallas as pl
from jax.experimental.pallas import tpu as pltpu

HIDDEN = 32  # A3TGCN out_channels


# ---------------------------------------------------------------------------
# Pallas kernel: one grid step per row-tile of N; all periods batched on lanes.
# ---------------------------------------------------------------------------
def _temporal_gnn_kernel(a_ref,        # [tn, N]        bf16  adjacency row tile
                         x_ref,        # [N, T*F]       bf16  all periods, lane-major
                         wbig_ref,     # [T*F, 2*T*H]   bf16  fused block-diag weights
                         bbig_ref,     # [1, 2*T*H]     f32   fused biases
                         probs_ref,    # [1, T*H]       f32   softmax(attention), lane-tiled
                         sum_ref,      # [T*H, H]       f32   stacked identities (period sum)
                         wlin_ref,     # [H, P]         f32   final Linear weight
                         blin_ref,     # [1, P]         f32   final Linear bias
                         out_ref):     # [tn, P]        f32
    # NOTE: y covers all N nodes (the A row-tile contraction needs every node's
    # transformed features); with many row tiles it is recomputed per tile —
    # for very large N hoist it into its own pass.
    y = jnp.dot(x_ref[...], wbig_ref[...],
                preferred_element_type=jnp.float32)                 # [N, 2*T*H]
    pre = jnp.dot(a_ref[...], y.astype(jnp.bfloat16),
                  preferred_element_type=jnp.float32) + bbig_ref[...]  # [tn, 2*T*H]

    th = probs_ref.shape[-1]                 # T * HIDDEN (vreg-aligned split)
    z = jax.nn.sigmoid(pre[:, :th])          # update gates, all periods
    h_tilde = jnp.tanh(pre[:, th:])          # candidate states, all periods
    g = (1.0 - z) * h_tilde * probs_ref[...]  # attention-weighted H_t, all periods

    # Sum over periods via one small MXU matmul (stacked identity blocks).
    acc = jnp.dot(g, sum_ref[...], preferred_element_type=jnp.float32)  # [tn, H]
    h = jnp.maximum(acc, 0.0)                                           # ReLU
    out_ref[...] = (jnp.dot(h, wlin_ref[...], preferred_element_type=jnp.float32)
                    + blin_ref[...]).astype(out_ref.dtype)


# ---------------------------------------------------------------------------
# Wrapper: parameter folding / layout plumbing + pallas_call
# ---------------------------------------------------------------------------
def temporal_gnn_forward(x_nft, a_hat, params, *, row_tile=None):
    """x_nft: [N, F, periods] float32 (PyTorch A3TGCN layout), a_hat: [N, N]."""
    n, f, periods = x_nft.shape
    h = HIDDEN
    th = periods * h

    probs = jax.nn.softmax(params["attention"])                    # [T]

    # Fold GCNConv weights through the TGCN gate linears (exact algebra).
    wzp = params["wz"] @ params["wlz"]                             # [F, H]
    whp = params["wh"] @ params["wlh"]                             # [F, H]
    bzp = params["bz"] @ params["wlz"] + params["blz"]             # [1, H]
    bhp = params["bh"] @ params["wlh"] + params["blh"]             # [1, H]

    # Batch all periods on the lane axis: block-diagonal fused weight.
    # Column layout: [ z(t=0..T-1) | h(t=0..T-1) ], H lanes per period.
    w_big = jnp.concatenate([jnp.kron(jnp.eye(periods, dtype=jnp.float32), wzp),
                             jnp.kron(jnp.eye(periods, dtype=jnp.float32), whp)],
                            axis=1)                                # [T*F, 2*T*H]
    b_big = jnp.concatenate([jnp.tile(bzp, (1, periods)),
                             jnp.tile(bhp, (1, periods))], axis=1)  # [1, 2*T*H]

    probs_lanes = jnp.repeat(probs, h)[None, :]                    # [1, T*H]
    sum_mat = jnp.tile(jnp.eye(h, dtype=jnp.float32), (periods, 1))  # [T*H, H]

    # Lane-dense input: [N, T*F], period-major column blocks of F features.
    x_flat = jnp.transpose(x_nft, (0, 2, 1)).reshape(n, periods * f)

    # bf16 MXU inputs, f32 accumulation / elementwise (halves DMA + VMEM too).
    a_bf = a_hat.astype(jnp.bfloat16)
    x_bf = x_flat.astype(jnp.bfloat16)
    w_big_bf = w_big.astype(jnp.bfloat16)

    # Row tiling over nodes: single tile for small N; "parallel" for megacore.
    if row_tile is None:
        row_tile = n if n <= 256 else 256
    assert n % row_tile == 0, "pad N to a multiple of the row tile"
    grid = (n // row_tile,)

    def full(shape):
        return pl.BlockSpec(shape, lambda i, _s=shape: (0,) * len(_s))

    in_specs = [
        pl.BlockSpec((row_tile, n), lambda i: (i, 0)),   # A_hat row tile
        full((n, periods * f)),                           # X (all periods)
        full((periods * f, 2 * th)),                      # fused weights
        full((1, 2 * th)),                                # fused biases
        full((1, th)),                                    # attention lanes
        full((th, h)),                                    # period-sum matrix
        full((h, periods)),                               # final Linear W
        full((1, periods)),                               # final Linear b
    ]
    out_spec = pl.BlockSpec((row_tile, periods), lambda i: (i, 0))

    grid_spec = pltpu.PrefetchScalarGridSpec(
        num_scalar_prefetch=0,
        grid=grid,
        in_specs=in_specs,
        out_specs=out_spec,
    )

    return pl.pallas_call(
        _temporal_gnn_kernel,
        out_shape=jax.ShapeDtypeStruct((n, periods), jnp.float32),
        grid_spec=grid_spec,
        compiler_params=pltpu.CompilerParams(
            dimension_semantics=("parallel",)),
    )(a_bf, x_bf, w_big_bf, b_big, probs_lanes, sum_mat,
      params["wlin"], params["blin"])


# ---------------------------------------------------------------------------
# Glue: dense GCN normalization (sym norm + self loops, unit edge weights)
# ---------------------------------------------------------------------------
def gcn_norm_dense(edge_index, num_nodes):
    src, dst = edge_index[0], edge_index[1]
    a = jnp.zeros((num_nodes, num_nodes), jnp.float32)
    a = a.at[dst, src].add(1.0)                       # message src -> dst (rows = target)
    a = a + jnp.eye(num_nodes, dtype=jnp.float32)     # add self loops
    deg = a.sum(axis=1)                               # in-degree incl. self loop
    dinv = jnp.where(deg > 0, jax.lax.rsqrt(deg), 0.0)
    return dinv[:, None] * a * dinv[None, :]


def init_params(key, f, periods):
    keys = jax.random.split(key, 12)

    def g(k, shape, scale=0.1):
        return scale * jax.random.normal(k, shape, jnp.float32)

    return dict(
        attention=g(keys[0], (periods,), 1.0),
        wz=g(keys[1], (f, HIDDEN)), bz=g(keys[2], (1, HIDDEN)),
        wh=g(keys[3], (f, HIDDEN)), bh=g(keys[4], (1, HIDDEN)),
        # first-half columns of linear_z / linear_h (the H-half multiplies 0)
        wlz=g(keys[5], (HIDDEN, HIDDEN)), blz=g(keys[6], (1, HIDDEN)),
        wlh=g(keys[7], (HIDDEN, HIDDEN)), blh=g(keys[8], (1, HIDDEN)),
        wlin=g(keys[9], (HIDDEN, periods)), blin=g(keys[10], (1, periods)),
    )


def reference(x_nft, a_hat, params):
    """Pure-JAX f32 reference mirroring the PyTorch forward (x: [N, F, periods])."""
    probs = jax.nn.softmax(params["attention"])
    acc = jnp.zeros((x_nft.shape[0], HIDDEN), jnp.float32)
    for t in range(x_nft.shape[-1]):
        xt = x_nft[:, :, t]
        cz = a_hat @ (xt @ params["wz"]) + params["bz"]
        ch = a_hat @ (xt @ params["wh"]) + params["bh"]
        z = jax.nn.sigmoid(cz @ params["wlz"] + params["blz"])
        ht = jnp.tanh(ch @ params["wlh"] + params["blh"])
        acc = acc + probs[t] * (1.0 - z) * ht
    h = jnp.maximum(acc, 0.0)
    return h @ params["wlin"] + params["blin"]


if __name__ == "__main__":
    key = jax.random.PRNGKey(0)
    k_x, k_p = jax.random.split(key)

    N, F, PERIODS = 16, 4, 8          # nodes, node_features, periods

    # Input in the PyTorch A3TGCN layout: [num_nodes, node_features, periods]
    x = jax.random.normal(k_x, (N, F, PERIODS), jnp.float32)

    # Undirected ring graph as edge_index [2, E]
    src = jnp.arange(N, dtype=jnp.int32)
    dst = (src + 1) % N
    edge_index = jnp.stack([jnp.concatenate([src, dst]),
                            jnp.concatenate([dst, src])])

    a_hat = gcn_norm_dense(edge_index, N)
    params = init_params(k_p, F, PERIODS)

    out = temporal_gnn_forward(x, a_hat, params)
    jax.block_until_ready(out)

    ref = reference(x, a_hat, params)
    assert out.shape == (N, PERIODS), out.shape
    # bf16 MXU inputs with f32 accumulation: observed |diff| ~1e-4; 5e-3 is a
    # comfortable margin that still catches any structural/semantic error.
    assert jnp.allclose(out, ref, atol=5e-3, rtol=5e-3), float(jnp.max(jnp.abs(out - ref)))
    print("KERNEL_OK")
</pallas_src>

<mosaic_0001>
module attributes {stable_mosaic.version = 11 : i64} {
  func.func @_temporal_gnn_kernel(%arg0: i32, %arg1: memref<16x16xbf16, #tpu.memory_space<vmem>>, %arg2: memref<16x32xbf16, #tpu.memory_space<vmem>>, %arg3: memref<32x512xbf16, #tpu.memory_space<vmem>>, %arg4: memref<1x512xf32, #tpu.memory_space<vmem>>, %arg5: memref<1x256xf32, #tpu.memory_space<vmem>>, %arg6: memref<256x32xf32, #tpu.memory_space<vmem>>, %arg7: memref<32x8xf32, #tpu.memory_space<vmem>>, %arg8: memref<1x8xf32, #tpu.memory_space<vmem>>, %arg9: memref<16x8xf32, #tpu.memory_space<vmem>>) attributes {dimension_semantics = [#tpu.dimension_semantics<parallel>], iteration_bounds = array<i64: 1>, scalar_prefetch = 0 : i64, scratch_operands = 0 : i64, tpu.core_type = #tpu.core_type<tc>, window_params = [{transform_indices = @transform_0, window_bounds = array<i64: 16, 16>}, {pipeline_mode = #tpu.pipeline_mode<synchronous>, transform_indices = @transform_1, window_bounds = array<i64: 16, 32>}, {pipeline_mode = #tpu.pipeline_mode<synchronous>, transform_indices = @transform_2, window_bounds = array<i64: 32, 512>}, {pipeline_mode = #tpu.pipeline_mode<synchronous>, transform_indices = @transform_3, window_bounds = array<i64: 1, 512>}, {pipeline_mode = #tpu.pipeline_mode<synchronous>, transform_indices = @transform_4, window_bounds = array<i64: 1, 256>}, {pipeline_mode = #tpu.pipeline_mode<synchronous>, transform_indices = @transform_5, window_bounds = array<i64: 256, 32>}, {pipeline_mode = #tpu.pipeline_mode<synchronous>, transform_indices = @transform_6, window_bounds = array<i64: 32, 8>}, {pipeline_mode = #tpu.pipeline_mode<synchronous>, transform_indices = @transform_7, window_bounds = array<i64: 1, 8>}, {transform_indices = @transform_8, window_bounds = array<i64: 16, 8>}]} {
    %c0 = arith.constant 0 : index
    %c0_0 = arith.constant 0 : index
    %0 = vector.load %arg2[%c0, %c0_0] : memref<16x32xbf16, #tpu.memory_space<vmem>>, vector<16x32xbf16>
    %c0_1 = arith.constant 0 : index
    %c0_2 = arith.constant 0 : index
    %1 = vector.load %arg3[%c0_1, %c0_2] : memref<32x512xbf16, #tpu.memory_space<vmem>>, vector<32x512xbf16>
    %cst = arith.constant dense<0.000000e+00> : vector<16x512xf32>
    %2 = tpu.matmul %0, %1, %cst {dimension_numbers = #tpu.dot_dimension_numbers<[1], [0], [0], [1], [0, 0, 1, 1], [], []>} : vector<16x32xbf16>, vector<32x512xbf16>, vector<16x512xf32> -> vector<16x512xf32>
    %c0_3 = arith.constant 0 : index
    %c0_4 = arith.constant 0 : index
    %3 = vector.load %arg1[%c0_3, %c0_4] : memref<16x16xbf16, #tpu.memory_space<vmem>>, vector<16x16xbf16>
    %4 = arith.truncf %2 : vector<16x512xf32> to vector<16x512xbf16>
    %cst_5 = arith.constant dense<0.000000e+00> : vector<16x512xf32>
    %5 = tpu.matmul %3, %4, %cst_5 {dimension_numbers = #tpu.dot_dimension_numbers<[1], [0], [0], [1], [0, 0, 1, 1], [], []>} : vector<16x16xbf16>, vector<16x512xbf16>, vector<16x512xf32> -> vector<16x512xf32>
    %c0_6 = arith.constant 0 : index
    %c0_7 = arith.constant 0 : index
    %6 = vector.load %arg4[%c0_6, %c0_7] : memref<1x512xf32, #tpu.memory_space<vmem>>, vector<1x512xf32>
    %7 = vector.broadcast %6 : vector<1x512xf32> to vector<16x512xf32>
    %8 = arith.addf %5, %7 : vector<16x512xf32>
    %9 = vector.extract_strided_slice %8 {offsets = [0, 0], sizes = [16, 256], strides = [1, 1]} : vector<16x512xf32> to vector<16x256xf32>
    %10 = arith.negf %9 : vector<16x256xf32>
    %11 = math.exp %10 : vector<16x256xf32>
    %cst_8 = arith.constant 1.000000e+00 : f32
    %12 = vector.broadcast %cst_8 : f32 to vector<16x256xf32>
    %13 = arith.addf %12, %11 : vector<16x256xf32>
    %14 = arith.divf %12, %13 : vector<16x256xf32>
    %15 = vector.extract_strided_slice %8 {offsets = [0, 256], sizes = [16, 256], strides = [1, 1]} : vector<16x512xf32> to vector<16x256xf32>
    %16 = math.tanh %15 : vector<16x256xf32>
    %cst_9 = arith.constant 1.000000e+00 : f32
    %17 = vector.broadcast %cst_9 : f32 to vector<16x256xf32>
    %18 = arith.subf %17, %14 : vector<16x256xf32>
    %19 = arith.mulf %18, %16 : vector<16x256xf32>
    %c0_10 = arith.constant 0 : index
    %c0_11 = arith.constant 0 : index
    %20 = vector.load %arg5[%c0_10, %c0_11] : memref<1x256xf32, #tpu.memory_space<vmem>>, vector<1x256xf32>
    %21 = vector.broadcast %20 : vector<1x256xf32> to vector<16x256xf32>
    %22 = arith.mulf %19, %21 : vector<16x256xf32>
    %c0_12 = arith.constant 0 : index
    %c0_13 = arith.constant 0 : index
    %23 = vector.load %arg6[%c0_12, %c0_13] : memref<256x32xf32, #tpu.memory_space<vmem>>, vector<256x32xf32>
    %cst_14 = arith.constant dense<0.000000e+00> : vector<16x32xf32>
    %24 = tpu.matmul %22, %23, %cst_14 {dimension_numbers = #tpu.dot_dimension_numbers<[1], [0], [0], [1], [0, 0, 1, 1], [], []>} : vector<16x256xf32>, vector<256x32xf32>, vector<16x32xf32> -> vector<16x32xf32>
    %cst_15 = arith.constant 0.000000e+00 : f32
    %25 = vector.broadcast %cst_15 : f32 to vector<16x32xf32>
    %26 = arith.maximumf %24, %25 : vector<16x32xf32>
    %c0_16 = arith.constant 0 : index
    %c0_17 = arith.constant 0 : index
    %27 = vector.load %arg7[%c0_16, %c0_17] : memref<32x8xf32, #tpu.memory_space<vmem>>, vector<32x8xf32>
    %cst_18 = arith.constant dense<0.000000e+00> : vector<16x8xf32>
    %28 = tpu.matmul %26, %27, %cst_18 {dimension_numbers = #tpu.dot_dimension_numbers<[1], [0], [0], [1], [0, 0, 1, 1], [], []>} : vector<16x32xf32>, vector<32x8xf32>, vector<16x8xf32> -> vector<16x8xf32>
    %c0_19 = arith.constant 0 : index
    %c0_20 = arith.constant 0 : index
    %29 = vector.load %arg8[%c0_19, %c0_20] : memref<1x8xf32, #tpu.memory_space<vmem>>, vector<1x8xf32>
    %30 = vector.broadcast %29 : vector<1x8xf32> to vector<16x8xf32>
    %31 = arith.addf %28, %30 : vector<16x8xf32>
    %c0_21 = arith.constant 0 : index
    %c0_22 = arith.constant 0 : index
    %32 = vector.load %arg9[%c0_21, %c0_22] : memref<16x8xf32, #tpu.memory_space<vmem>>, vector<16x8xf32>
    tpu.vector_store %arg9[%c0_21, %c0_22], %31 {strides = array<i32>} : memref<16x8xf32, #tpu.memory_space<vmem>>, vector<16x8xf32>,
    return
  }
  func.func @transform_0(%arg0: i32) -> (i32, i32) {
    %c0_i32 = arith.constant 0 : i32
    %c0_i32_0 = arith.constant 0 : i32
    return %arg0, %c0_i32 : i32, i32
  }
  func.func @transform_1(%arg0: i32) -> (i32, i32) {
    %c0_i32 = arith.constant 0 : i32
    %c0_i32_0 = arith.constant 0 : i32
    %c0_i32_1 = arith.constant 0 : i32
    return %c0_i32, %c0_i32_0 : i32, i32
  }
  func.func @transform_2(%arg0: i32) -> (i32, i32) {
    %c0_i32 = arith.constant 0 : i32
    %c0_i32_0 = arith.constant 0 : i32
    %c0_i32_1 = arith.constant 0 : i32
    return %c0_i32, %c0_i32_0 : i32, i32
  }
  func.func @transform_3(%arg0: i32) -> (i32, i32) {
    %c0_i32 = arith.constant 0 : i32
    %c0_i32_0 = arith.constant 0 : i32
    %c0_i32_1 = arith.constant 0 : i32
    return %c0_i32, %c0_i32_0 : i32, i32
  }
  func.func @transform_4(%arg0: i32) -> (i32, i32) {
    %c0_i32 = arith.constant 0 : i32
    %c0_i32_0 = arith.constant 0 : i32
    %c0_i32_1 = arith.constant 0 : i32
    return %c0_i32, %c0_i32_0 : i32, i32
  }
  func.func @transform_5(%arg0: i32) -> (i32, i32) {
    %c0_i32 = arith.constant 0 : i32
    %c0_i32_0 = arith.constant 0 : i32
    %c0_i32_1 = arith.constant 0 : i32
    return %c0_i32, %c0_i32_0 : i32, i32
  }
  func.func @transform_6(%arg0: i32) -> (i32, i32) {
    %c0_i32 = arith.constant 0 : i32
    %c0_i32_0 = arith.constant 0 : i32
    %c0_i32_1 = arith.constant 0 : i32
    return %c0_i32, %c0_i32_0 : i32, i32
  }
  func.func @transform_7(%arg0: i32) -> (i32, i32) {
    %c0_i32 = arith.constant 0 : i32
    %c0_i32_0 = arith.constant 0 : i32
    %c0_i32_1 = arith.constant 0 : i32
    return %c0_i32, %c0_i32_0 : i32, i32
  }
  func.func @transform_8(%arg0: i32) -> (i32, i32) {
    %c0_i32 = arith.constant 0 : i32
    %c0_i32_0 = arith.constant 0 : i32
    return %arg0, %c0_i32 : i32, i32
  }
}

</mosaic_0001>

<bundles_post_ra>
// kernel: tpu_custom_call.1
= control target key start
LH: loop header
LB: loop body
LE: loop exit
PB: predicated region body
PF: predicated region fallthrough
CT: control target
= control target key end

     0   :  { %v713_v1 = vmov 0   ;;  %vm85_vm0 = vcmask 261120   ;;  %vm208_vm1 = vcmask 130048   ;;  %vm551_vm2 = vcmask 64512   ;;  %s922_s2 = inlined_call_operand.vmem [shape: bf16[32,512], index: 2, kind: input, shape index: {}]   ;;  %s923_s1 = inlined_call_operand.vmem [shape: bf16[16,32], index: 1, kind: input, shape index: {}]   ;;  %s924_s0 = inlined_call_operand.vmem [shape: bf16[16,16], index: 0, kind: input, shape index: {}]   ;;  %s925_s5 = inlined_call_operand.vmem [shape: f32[256,32], index: 5, kind: input, shape index: {}]   ;;  %s926_s3 = inlined_call_operand.vmem [shape: f32[1,512], index: 3, kind: input, shape index: {}]   ;;  %s927_s4 = inlined_call_operand.vmem [shape: f32[1,256], index: 4, kind: input, shape index: {}]   ;;  %s928_s6 = inlined_call_operand.vmem [shape: f32[32,8], index: 6, kind: input, shape index: {}]   ;;  %s929_s7 = inlined_call_operand.vmem [shape: f32[1,8], index: 7, kind: input, shape index: {}]   ;;  %s930_s8 = inlined_call_operand.vmem [shape: f32[16,8], index: 8, kind: output, shape index: {}]  }
   0x1   :  { %v675_v0 = vld [vmem:[%s922_s2 + $0x4] ss:$16 sps:$4 sm:$0xff]   ;;  %121 = vmatprep.mubr.bf16.mxu1 %v713_v1  ;;  %244 = vmatprep.mubr.bf16.mxu0 %v713_v1  ;;  %v677_v2 = vld [vmem:[%s922_s2] ss:$16 sps:$4 sm:$0xff]   ;;  %v684_v5 = vld [vmem:[%s922_s2 + $0xc] ss:$16 sps:$4 sm:$0xff]  }
   0x2   :  { %89 = vmatprep.subr.bf16.mxu1 %v675_v0  ;;  %v678_v3 = vld [vmem:[%s922_s2 + $0x24] ss:$16 sps:$4 sm:$0xff]   ;;  %v680_v4 = vld [vmem:[%s922_s2 + $0x20] ss:$16 sps:$4 sm:$0xff]   ;;  %v682_v7 = vld [vmem:[%s922_s2 + $0x8] ss:$16 sps:$4 sm:$0xff]  }
   0x3   :  { %90 = vmatpush1.bf16.msra.mxu1 %v677_v2  ;;  %v681_v6 = vld [vmem:[%s923_s1] sm:$0xff]   ;;  %v687_v8 = vld [vmem:[%s922_s2 + $0x2c] ss:$16 sps:$4 sm:$0xff]   ;;  %v685_v9 = vld [vmem:[%s922_s2 + $0x28] ss:$16 sps:$4 sm:$0xff]  }
   0x4   :  { %91 = vmatprep.subr.bf16.mxu1 %v678_v3  ;;  %v688_v16 = vld [vmem:[%s924_s0] sm:$0xff]   ;;  %v367_v24 = vld [vmem:[%s925_s5 + $0x88] sm:$0xff]  ;;  %v368_v29 = vld [vmem:[%s925_s5 + $0x90] sm:$0xff] }
   0x5   :  { %v366_v23 = vld [vmem:[%s925_s5 + $0x80] sm:$0xff]  ;;  %v351_v27 = vld [vmem:[%s925_s5 + $0x8] sm:$0xff]  ;;  %v369_v30 = vld [vmem:[%s925_s5 + $0x98] sm:$0xff] }
   0x6   :  { %v634_v25 = vpack.c.bf16 %v367_v24, %v366_v23  ;;  %v350_v26 = vld [vmem:[%s925_s5] sm:$0xff]  ;;  %v638_v31 = vpack.c.bf16 %v369_v30, %v368_v29  ;;  %v352_v32 = vld [vmem:[%s925_s5 + $0x10] sm:$0xff]  ;;  %v353_v33 = vld [vmem:[%s925_s5 + $0x18] sm:$0xff] }
   0x7   :  { %92 = vmatpush1.bf16.msra.mxu1 %v680_v4  ;;  %v636_v28 = vpack.c.bf16 %v351_v27, %v350_v26  ;;  %v640_v34 = vpack.c.bf16 %v353_v33, %v352_v32  ;;  %v370_v35 = vld [vmem:[%s925_s5 + $0xa0] sm:$0xff]  ;;  %v371_v36 = vld [vmem:[%s925_s5 + $0xa8] sm:$0xff]  ;;  %v372_v41 = vld [vmem:[%s925_s5 + $0xb0] sm:$0xff] }
   0x8   :  { %132 = vmatprep.subr.bf16.mxu1 %v684_v5  ;;  %v642_v37 = vpack.c.bf16 %v371_v36, %v370_v35  ;;  %v354_v38 = vld [vmem:[%s925_s5 + $0x20] sm:$0xff]  ;;  %v355_v39 = vld [vmem:[%s925_s5 + $0x28] sm:$0xff]  ;;  %v373_v42 = vld [vmem:[%s925_s5 + $0xb8] sm:$0xff] }
   0x9   :  { %v644_v40 = vpack.c.bf16 %v355_v39, %v354_v38  ;;  %v646_v43 = vpack.c.bf16 %v373_v42, %v372_v41  ;;  %v356_v44 = vld [vmem:[%s925_s5 + $0x30] sm:$0xff]  ;;  %v357_v45 = vld [vmem:[%s925_s5 + $0x38] sm:$0xff]  ;;  %v374_v47 = vld [vmem:[%s925_s5 + $0xc0] sm:$0xff] }
   0xa   :  { %567 = vmatmul.mubr.msk.bf16.vlgmr.msra.gmra.mrb[0].mxu1 %vm85_vm0, %v681_v6  ;;  %v648_v46 = vpack.c.bf16 %v357_v45, %v356_v44  ;;  %v375_v48 = vld [vmem:[%s925_s5 + $0xc8] sm:$0xff]  ;;  %v358_v50 = vld [vmem:[%s925_s5 + $0x40] sm:$0xff]  ;;  %v376_v53 = vld [vmem:[%s925_s5 + $0xd0] sm:$0xff] }
   0xb   :  { %133 = vmatpush1.bf16.msra.mxu1 %v682_v7  ;;  %164 = vmatprep.mubr.bf16.mxu1 %v713_v1  ;;  %v650_v49 = vpack.c.bf16 %v375_v48, %v374_v47  ;;  %v359_v51 = vld [vmem:[%s925_s5 + $0x48] sm:$0xff]  ;;  %v377_v54 = vld [vmem:[%s925_s5 + $0xd8] sm:$0xff]  ;;  %v360_v56 = vld [vmem:[%s925_s5 + $0x50] sm:$0xff]  ;;  %v183_v7 = vlaneseq }
   0xc   :  { %134 = vmatprep.subr.bf16.mxu1 %v687_v8  ;;  %v652_v52 = vpack.c.bf16 %v359_v51, %v358_v50  ;;  %v654_v55 = vpack.c.bf16 %v377_v54, %v376_v53  ;;  %v361_v57 = vld [vmem:[%s925_s5 + $0x58] sm:$0xff]  ;;  %v378_v59 = vld [vmem:[%s925_s5 + $0xe0] sm:$0xff]  ;;  %v379_v60 = vld [vmem:[%s925_s5 + $0xe8] sm:$0xff] }
   0xd   :  { %v656_v58 = vpack.c.bf16 %v361_v57, %v360_v56  ;;  %v658_v61 = vpack.c.bf16 %v379_v60, %v378_v59  ;;  %v362_v62 = vld [vmem:[%s925_s5 + $0x60] sm:$0xff]  ;;  %v363_v63 = vld [vmem:[%s925_s5 + $0x68] sm:$0xff]  ;;  %v381_v2 = vld [vmem:[%s925_s5 + $0xf8] sm:$0xff]  ;;  %v887_v8 = vshrl.u32 %v183_v7, 7 }
   0xe   :  { %v660_v0 = vpack.c.bf16 %v363_v63, %v362_v62  ;;  %v364_v4 = vld [vmem:[%s925_s5 + $0x70] sm:$0xff]  ;;  %v365_v5 = vld [vmem:[%s925_s5 + $0x78] sm:$0xff]  ;;  %v334_v48 = vld [vmem:[%s927_s4] sm:$0x3] }
   0xf   :  { %135 = vmatpush1.bf16.msra.mxu1 %v685_v9  ;;  %v185_v9 = vsub.s32 0, %v887_v8  ;;  %v193_v24 = vsub.s32 2, %v887_v8  ;;  %v197_v26 = vsub.s32 3, %v887_v8 }
  0x11   :  { %v339_v56 = vrot.slane %v334_v48, %v185_v9 }
  0x12   :  { %568 = vmatmul.mubr.msk.bf16.vlgmr.msra.gmra.mrb[4].mxu1 %vm85_vm0, %v681_v6  ;;  %v664_v6 = vpack.c.bf16 %v365_v5, %v364_v4  ;;  %v459_v5 = vld [vmem:[%s928_s6] sm:$0xff] }
  0x13   :  { %287 = vmatprep.mubr.bf16.mxu1 %v713_v1  ;;  %v380_v1 = vld [vmem:[%s925_s5 + $0xf0] sm:$0xff] }
  0x14   :  { %v662_v3 = vpack.c.bf16 %v381_v2, %v380_v1 }
  0xdd   :  { %v123_v10 = vpop.f32.mrb[0].mxu1 }
  0xde   :  { %v125_v11 = vpop.f32.mrb[1].mxu1 }
  0xdf   :  { %v127_v12 = vpop.f32.mrb[2].mxu1 }
  0xe0   :  { %v177_v13 = vpack.c.bf16 %v127_v12, %v123_v10  ;;  %v129_v14 = vpop.f32.mrb[3].mxu1  ;;  %v181_v10 = vld [vmem:[%s926_s3] sm:$0xf] }
  0xe1   :  { %v178_v15 = vpack.c.bf16 %v129_v14, %v125_v11  ;;  %v189_v11 = vsub.s32 1, %v887_v8  ;;  %v186_v12 = vrot.slane %v181_v10, %v185_v9  ;;  %v198_v30 = vrot.slane %v181_v10, %v197_v26  ;;  %v461_v8 = vld [vmem:[%s928_s6 + $0x10] sm:$0xff]  ;;  %v462_v9 = vld [vmem:[%s928_s6 + $0x18] sm:$0xff] }
  0xe3   :  { %212 = vmatprep.subr.bf16.mxu0 %v178_v15  ;;  %v343_v54 = vrot.slane %v334_v48, %v189_v11 }
  0xe4   :  { %213 = vmatpush1.bf16.msra.mxu0 %v177_v13  ;;  %v190_v13 = vrot.slane %v181_v10, %v189_v11 }
  0xe5   :  { %v166_v17 = vpop.f32.mrb[4].mxu1  ;;  %635 = vmatprep.subr.bf16.mxu0 %v634_v25 }
  0xe6   :  { %v168_v18 = vpop.f32.mrb[5].mxu1 }
  0xe7   :  { %v170_v19 = vpop.f32.mrb[6].mxu1  ;;  %570 = vmatmul.mubr.msk.bf16.vlgmr.msra.gmra.mrb[0].mxu0 %vm208_vm1, %v688_v16 }
  0xe8   :  { %v179_v20 = vpack.c.bf16 %v170_v19, %v166_v17  ;;  %v172_v21 = vpop.f32.mrb[7].mxu1  ;;  %637 = vmatpush3.bf16.msra.mxu0 %v636_v28  ;;  %v194_v28 = vrot.slane %v181_v10, %v193_v24  ;;  %v670_v10 = vpack.c.bf16 %v462_v9, %v461_v8 }
  0xe9   :  { %v180_v22 = vpack.c.bf16 %v172_v21, %v168_v18  ;;  %639 = vmatprep.subr.bf16.mxu0 %v638_v31 }
  0xeb   :  { %255 = vmatprep.subr.bf16.mxu1 %v180_v22 }
  0xec   :  { %256 = vmatpush1.bf16.msra.mxu1 %v179_v20  ;;  %641 = vmatpush3.bf16.msra.mxu0 %v640_v34 }
  0xed   :  { %643 = vmatprep.subr.bf16.mxu0 %v642_v37 }
  0xef   :  { %571 = vmatmul.mubr.msk.bf16.vlgmr.msra.gmra.mrb[8].mxu1 %vm208_vm1, %v688_v16 }
  0xf0   :  { %645 = vmatpush3.bf16.msra.mxu0 %v644_v40 }
  0xf1   :  { %647 = vmatprep.subr.bf16.mxu0 %v646_v43 }
  0xf4   :  { %649 = vmatpush3.bf16.msra.mxu0 %v648_v46 }
  0xf5   :  { %651 = vmatprep.subr.bf16.mxu0 %v650_v49 }
  0xf8   :  { %653 = vmatpush3.bf16.msra.mxu0 %v652_v52 }
  0xf9   :  { %655 = vmatprep.subr.bf16.mxu0 %v654_v55 }
  0xfc   :  { %657 = vmatpush3.bf16.msra.mxu0 %v656_v58 }
  0xfd   :  { %659 = vmatprep.subr.bf16.mxu0 %v658_v61 }
 0x100   :  { %661 = vmatpush3.bf16.msra.mxu0 %v660_v0 }
 0x101   :  { %663 = vmatprep.subr.bf16.mxu0 %v662_v3 }
 0x104   :  { %665 = vmatpush3.bf16.msra.mxu0 %v664_v6  ;;  %v460_v6 = vld [vmem:[%s928_s6 + $0x8] sm:$0xff] }
 0x105   :  { %v666_v7 = vpack.c.bf16 %v460_v6, %v459_v5 }
 0x107   :  { %667 = vmatprep.subr.bf16.mxu1 %v666_v7 }
 0x108   :  { %669 = vmatpush3.bf16.msra.mxu1 %v666_v7 }
 0x109   :  { %671 = vmatprep.subr.bf16.mxu1 %v670_v10 }
 0x10c   :  { %673 = vmatpush3.bf16.msra.mxu1 %v670_v10 }
 0x1ba   :  { %v246_v14 = vpop.f32.mrb[0].mxu0 }
 0x1bb   :  { %v247_v15 = vadd.f32 %v246_v14, %v186_v12  ;;  %v248_v16 = vpop.f32.mrb[1].mxu0 }
 0x1bc   :  { %v249_v17 = vadd.f32 %v248_v16, %v190_v13  ;;  %v250_v18 = vpop.f32.mrb[2].mxu0 }
 0x1bd   :  { %v572_v19 = vmul.f32 -1.442695, %v247_v15  ;;  %v251_v20 = vadd.f32 %v250_v18, %v186_v12  ;;  %v252_v21 = vpop.f32.mrb[3].mxu0 }
 0x1be   :  { %v573_v22 = vmul.f32 -1.442695, %v249_v17  ;;  %v253_v23 = vadd.f32 %v252_v21, %v190_v13 }
 0x1bf   :  { %689 = vpow2.f32 %v572_v19  ;;  %v574_v25 = vmul.f32 -1.442695, %v251_v20  ;;  %v576_v19 = vld [vmem:[%s929_s7] ss:$0 sm:$0xff] }
 0x1c0   :  { %691 = vpow2.f32 %v573_v22  ;;  %v575_v27 = vmul.f32 -1.442695, %v253_v23 }
 0x1c1   :  { %693 = vpow2.f32 %v574_v25 }
 0x1c2   :  { %695 = vpow2.f32 %v575_v27  ;;  %v289_v29 = vpop.f32.mrb[8].mxu1 }
 0x1c3   :  { %v291_v31 = vpop.f32.mrb[9].mxu1  ;;  %v290_v34 = vadd.f32 %v289_v29, %v194_v28 }
 0x1c4   :  { %v293_v32 = vpop.f32.mrb[10].mxu1  ;;  %v292_v35 = vadd.f32 %v291_v31, %v198_v30 }
 0x1c5   :  { %v295_v33 = vpop.f32.mrb[11].mxu1  ;;  %697 = vtanh.f32 %v290_v34  ;;  %v294_v43 = vadd.f32 %v293_v32, %v194_v28 }
 0x1c6   :  { %699 = vtanh.f32 %v292_v35  ;;  %v296_v45 = vadd.f32 %v295_v33, %v198_v30 }
 0x1c9   :  { %v690_v36 = vpop.eup %689 }
 0x1ca   :  { %v692_v37 = vpop.eup %691  ;;  %v310_v38 = vadd.f32 1.0, %v690_v36 }
 0x1cb   :  { %v694_v39 = vpop.eup %693  ;;  %v311_v40 = vadd.f32 1.0, %v692_v37 }
 0x1cc   :  { %v696_v41 = vpop.eup %695  ;;  %701 = vrcp.f32 %v310_v38  ;;  %v312_v42 = vadd.f32 1.0, %v694_v39 }
 0x1cd   :  { %703 = vrcp.f32 %v311_v40  ;;  %v313_v44 = vadd.f32 1.0, %v696_v41 }
 0x1ce   :  { %705 = vrcp.f32 %v312_v42 }
 0x1cf   :  { %707 = vrcp.f32 %v313_v44  ;;  %v698_v46 = vpop.eup %697 }
 0x1d0   :  { %709 = vtanh.f32 %v294_v43  ;;  %v700_v47 = vpop.eup %699 }
 0x1d1   :  { %711 = vtanh.f32 %v296_v45 }
 0x1d6   :  { %v702_v49 = vpop.eup %701 }
 0x1d7   :  { %v704_v50 = vpop.eup %703  ;;  %v326_v51 = vsub.f32 1.0, %v702_v49 }
 0x1d8   :  { %v706_v52 = vpop.eup %705  ;;  %v327_v53 = vsub.f32 1.0, %v704_v50 }
 0x1d9   :  { %v708_v55 = vpop.eup %707  ;;  %v328_v57 = vsub.f32 1.0, %v706_v52  ;;  %v330_v58 = vmul.f32 %v698_v46, %v326_v51 }
 0x1da   :  { %v710_v59 = vpop.eup %709  ;;  %v329_v60 = vsub.f32 1.0, %v708_v55  ;;  %v331_v61 = vmul.f32 %v700_v47, %v327_v53 }
 0x1db   :  { %v712_v62 = vpop.eup %711  ;;  %v332_v63 = vmul.f32 %v710_v59, %v328_v57  ;;  %v346_v2 = vmul.f32 %v339_v56, %v330_v58 }
 0x1dc   :  { %v347_v0 = vmul.f32 %v343_v54, %v331_v61  ;;  %v333_v1 = vmul.f32 %v712_v62, %v329_v60 }
 0x1dd   :  { %v348_v4 = vmul.f32 %v339_v56, %v332_v63 }
 0x1de   :  { %446 = vmatprep.mubr.f32.mxu0 %v347_v0  ;;  %v349_v3 = vmul.f32 %v343_v54, %v333_v1 }
 0x1df   :  { %447 = vmatmul.mubr.f32.vlgmr.msra.gmra.mrb[4].mxu0 %v346_v2 }
 0x1e0   :  { %451 = vmatprep.mubr.f32.mxu0 %v349_v3 }
 0x1e3   :  { %452 = vmatmul.mubr.f32.gmra.mrb[6].mxu0 %v348_v4 }
 0x2b2   :  { %v611_v11 = vpop.f32.mrb[4].mxu0 }
 0x2b3   :  { %v612_v12 = vpop.f32.mrb[5].mxu0 }
 0x2b4   :  { %v613_v13 = vadd.f32 %v612_v12, %v611_v11 }
 0x2b6   :  { %v457_v14 = vmax.f32 %v613_v13, 0.0  ;;  %v614_v15 = vpop.f32.mrb[6].mxu0 }
 0x2b7   :  { %v615_v16 = vpop.f32.mrb[7].mxu0 }
 0x2b8   :  { %v616_v17 = vadd.f32 %v615_v16, %v614_v15  ;;  %631 = vmatprep.mubr.msk.f32.mxu1 %vm85_vm0, %v457_v14 }
 0x2ba   :  { %v458_v18 = vmax.f32 %v616_v17, 0.0 }
 0x2bc   :  { %632 = vmatmul.mubr.msk.f32.vlgmr.msra.gmra.mrb[12].mxu1 %vm85_vm0, %v458_v18 }
 0x38f   :  { %v633_v20 = vpop.f32.mrb[12].mxu1 }
 0x390   :  { %v548_v21 = vadd.f32 %v633_v20, %v576_v19  ;;  %v542_v22 = vpop.f32.mrb[13].mxu1 }
 0x391   :  { %v543_v23 = vadd.f32 %v576_v19, %v542_v22 }
 0x392   :  { %553 = vst.msk [vmem:[%s930_s8 + $0x8] sm:$0xff] %vm551_vm2, %v548_v21 }
 0x393   :  { %552 = vst.msk [vmem:[%s930_s8] sm:$0xff] %vm551_vm2, %v543_v23 }

</bundles_post_ra>
